<compile_context>
chip_gen: v6e
topology: v6e:2x2x1
jax: 0.10.0
libtpu: 0.0.40
codegen_flags: <defaults>
</compile_context>

<pallas_src>
from functools import partial

import numpy as np
import jax
import jax.numpy as jnp
from jax.experimental import pallas as pl
from jax.experimental.pallas import tpu as pltpu


# ----------------------------- Pallas kernel -------------------------------
def mu_sigma_kernel(r_ref, w1_ref, b1_ref, w2_ref, b2_ref, out_ref):
    """One batch-tile of the MuSigmaEncoder forward.

    r_ref  : (TB, r_dim)        bf16 input representation tile
    w1_ref : (r_dim, r_dim)     bf16 r_to_hidden weight
    b1_ref : (1, r_dim)         f32  r_to_hidden bias
    w2_ref : (r_dim, 2*z_dim)   bf16 fused [hidden_to_mu | hidden_to_sigma] weight
    b2_ref : (1, 2*z_dim)       f32  fused bias
    out_ref: (TB, 2*z_dim)      f32  fused output [mu | sigma]
    """
    two_z = out_ref.shape[-1]
    z_dim = two_z // 2

    # hidden = relu(r @ W1 + b1)   (MXU in bf16, f32 accumulate + epilogue)
    hidden = jnp.maximum(
        jnp.dot(r_ref[...], w1_ref[...], preferred_element_type=jnp.float32)
        + b1_ref[...],
        0.0,
    )

    # Fused head matmul: one MXU push produces both mu and sigma logits.
    heads = (
        jnp.dot(hidden.astype(jnp.bfloat16), w2_ref[...],
                preferred_element_type=jnp.float32)
        + b2_ref[...]
    )

    # Apply the sigma transform only to lanes >= z_dim via a lane mask;
    # no sub-vreg lane slicing, single lane-contiguous store.
    lane = jax.lax.broadcasted_iota(jnp.int32, heads.shape, dimension=1)
    sigma_part = 0.1 + 0.9 * jax.nn.sigmoid(heads)      # sigmoid -> EUP slot (cheap)
    out_ref[...] = jnp.where(lane < z_dim, heads, sigma_part)


# --------------------------- parameter prep ---------------------------------
def prepare_params(params):
    """One-time preprocessing: fuse the two head linears and cast MXU operands
    to bf16.  Do this once, outside the per-step forward."""
    w1 = params["w_hidden"].astype(jnp.bfloat16)                      # (r_dim, r_dim)
    b1 = params["b_hidden"].astype(jnp.float32)                       # (1, r_dim)
    w2 = jnp.concatenate([params["w_mu"], params["w_sigma"]],
                         axis=1).astype(jnp.bfloat16)                 # (r_dim, 2*z_dim)
    b2 = jnp.concatenate([params["b_mu"], params["b_sigma"]],
                         axis=1).astype(jnp.float32)                  # (1, 2*z_dim)
    return (w1, b1, w2, b2)


# ------------------------------- wrapper ------------------------------------
def _round_up8(x):
    return -(-x // 8) * 8


def _pick_tile(batch, cap=512):
    """Batch tile: multiple of 8, capped, and (if the batch allows it) at least
    2 grid steps so v7x can shard the parallel axis across its two TCs."""
    b8 = _round_up8(batch)
    tile = min(cap, b8)
    if b8 > 8 and b8 // tile < 2:
        tile = _round_up8(-(-b8 // 2))
    return tile


@partial(jax.jit, static_argnames=("tile_b",))
def _forward_impl(r, w1, b1, w2, b2, *, tile_b):
    batch, r_dim = r.shape
    two_z = w2.shape[1]
    z_dim = two_z // 2

    # Pad batch up to a multiple of the tile; padded rows are discarded below.
    b_pad = -(-batch // tile_b) * tile_b
    r_in = r.astype(jnp.bfloat16)
    if b_pad != batch:
        r_in = jnp.zeros((b_pad, r_dim), jnp.bfloat16).at[:batch].set(r_in)

    grid = (b_pad // tile_b,)
    rep = lambda i: (0, 0)   # weights/biases replicated across batch tiles

    fused = pl.pallas_call(
        mu_sigma_kernel,
        out_shape=jax.ShapeDtypeStruct((b_pad, two_z), jnp.float32),
        grid=grid,
        in_specs=[
            pl.BlockSpec((tile_b, r_dim), lambda i: (i, 0)),   # r tile
            pl.BlockSpec((r_dim, r_dim), rep),                 # w1
            pl.BlockSpec((1, r_dim), rep),                     # b1
            pl.BlockSpec((r_dim, two_z), rep),                 # w2 (fused heads)
            pl.BlockSpec((1, two_z), rep),                     # b2 (fused heads)
        ],
        out_specs=pl.BlockSpec((tile_b, two_z), lambda i: (i, 0)),
        compiler_params=pltpu.CompilerParams(
            dimension_semantics=("parallel",)),
    )(r_in, w1, b1, w2, b2)

    # Split mu / sigma outside the kernel (plain XLA slices, fused under jit).
    mu = fused[:batch, :z_dim]
    sigma = fused[:batch, z_dim:]
    return mu, sigma


def mu_sigma_encoder_forward(r, prepped_params, *, tile_cap=512):
    """r: (batch, r_dim) float32. prepped_params: output of prepare_params.

    Returns (mu, sigma), each (batch, z_dim) float32.
    """
    w1, b1, w2, b2 = prepped_params
    tile_b = _pick_tile(r.shape[0], tile_cap)
    return _forward_impl(r, w1, b1, w2, b2, tile_b=tile_b)


# ------------------------- pure-JAX reference -------------------------------
def reference_forward(r, params):
    hidden = jnp.maximum(r @ params["w_hidden"] + params["b_hidden"], 0.0)
    mu = hidden @ params["w_mu"] + params["b_mu"]
    sigma = 0.1 + 0.9 * jax.nn.sigmoid(hidden @ params["w_sigma"] + params["b_sigma"])
    return mu, sigma


# --------------------------------- main --------------------------------------
if __name__ == "__main__":
    batch, r_dim, z_dim = 8, 32, 16

    key = jax.random.PRNGKey(0)
    ks = jax.random.split(key, 8)

    def init(k, shape, scale=0.1):
        return (scale * jax.random.normal(k, shape)).astype(jnp.float32)

    # Nonzero biases so the bias-broadcast paths are actually exercised.
    params = {
        "w_hidden": init(ks[0], (r_dim, r_dim)),
        "b_hidden": init(ks[1], (1, r_dim)),
        "w_mu":     init(ks[2], (r_dim, z_dim)),
        "b_mu":     init(ks[3], (1, z_dim)),
        "w_sigma":  init(ks[4], (r_dim, z_dim)),
        "b_sigma":  init(ks[5], (1, z_dim)),
    }

    r = jax.random.normal(ks[6], (batch, r_dim)).astype(jnp.float32)

    prepped = prepare_params(params)                 # one-time: concat + bf16 cast
    mu, sigma = mu_sigma_encoder_forward(r, prepped)
    mu, sigma = jax.block_until_ready((mu, sigma))

    mu_ref, sigma_ref = reference_forward(r, params)
    # bf16 MXU operands -> relaxed parity tolerance vs the f32 reference.
    np.testing.assert_allclose(np.asarray(mu), np.asarray(mu_ref),
                               rtol=2e-2, atol=2e-2)
    np.testing.assert_allclose(np.asarray(sigma), np.asarray(sigma_ref),
                               rtol=2e-2, atol=2e-2)
    assert mu.shape == (batch, z_dim) and sigma.shape == (batch, z_dim)
    assert bool(jnp.all(sigma >= 0.1)) and bool(jnp.all(sigma <= 1.0))

    # TODO(synk): sampling from Normal(mu, sigma) happens outside this module's
    # forward and is left to the caller (host-side jax.random), not kernelized.
    print("KERNEL_OK")
</pallas_src>

<mosaic_0001>
module attributes {stable_mosaic.version = 11 : i64} {
  func.func @mu_sigma_kernel(%arg0: i32, %arg1: memref<8x32xbf16, #tpu.memory_space<vmem>>, %arg2: memref<32x32xbf16, #tpu.memory_space<vmem>>, %arg3: memref<1x32xf32, #tpu.memory_space<vmem>>, %arg4: memref<32x32xbf16, #tpu.memory_space<vmem>>, %arg5: memref<1x32xf32, #tpu.memory_space<vmem>>, %arg6: memref<8x32xf32, #tpu.memory_space<vmem>>) attributes {dimension_semantics = [#tpu.dimension_semantics<parallel>], iteration_bounds = array<i64: 1>, scalar_prefetch = 0 : i64, scratch_operands = 0 : i64, tpu.core_type = #tpu.core_type<tc>, window_params = [{transform_indices = @transform_0, window_bounds = array<i64: 8, 32>}, {pipeline_mode = #tpu.pipeline_mode<synchronous>, transform_indices = @transform_1, window_bounds = array<i64: 32, 32>}, {pipeline_mode = #tpu.pipeline_mode<synchronous>, transform_indices = @transform_2, window_bounds = array<i64: 1, 32>}, {pipeline_mode = #tpu.pipeline_mode<synchronous>, transform_indices = @transform_3, window_bounds = array<i64: 32, 32>}, {pipeline_mode = #tpu.pipeline_mode<synchronous>, transform_indices = @transform_4, window_bounds = array<i64: 1, 32>}, {transform_indices = @transform_5, window_bounds = array<i64: 8, 32>}]} {
    %c0 = arith.constant 0 : index
    %c0_0 = arith.constant 0 : index
    %0 = vector.load %arg1[%c0, %c0_0] : memref<8x32xbf16, #tpu.memory_space<vmem>>, vector<8x32xbf16>
    %c0_1 = arith.constant 0 : index
    %c0_2 = arith.constant 0 : index
    %1 = vector.load %arg2[%c0_1, %c0_2] : memref<32x32xbf16, #tpu.memory_space<vmem>>, vector<32x32xbf16>
    %cst = arith.constant dense<0.000000e+00> : vector<8x32xf32>
    %2 = tpu.matmul %0, %1, %cst {dimension_numbers = #tpu.dot_dimension_numbers<[1], [0], [0], [1], [0, 0, 1, 1], [], []>} : vector<8x32xbf16>, vector<32x32xbf16>, vector<8x32xf32> -> vector<8x32xf32>
    %c0_3 = arith.constant 0 : index
    %c0_4 = arith.constant 0 : index
    %3 = vector.load %arg3[%c0_3, %c0_4] : memref<1x32xf32, #tpu.memory_space<vmem>>, vector<1x32xf32>
    %4 = vector.broadcast %3 : vector<1x32xf32> to vector<8x32xf32>
    %5 = arith.addf %2, %4 : vector<8x32xf32>
    %cst_5 = arith.constant 0.000000e+00 : f32
    %6 = vector.broadcast %cst_5 : f32 to vector<8x32xf32>
    %7 = arith.maximumf %5, %6 : vector<8x32xf32>
    %8 = arith.truncf %7 : vector<8x32xf32> to vector<8x32xbf16>
    %c0_6 = arith.constant 0 : index
    %c0_7 = arith.constant 0 : index
    %9 = vector.load %arg4[%c0_6, %c0_7] : memref<32x32xbf16, #tpu.memory_space<vmem>>, vector<32x32xbf16>
    %cst_8 = arith.constant dense<0.000000e+00> : vector<8x32xf32>
    %10 = tpu.matmul %8, %9, %cst_8 {dimension_numbers = #tpu.dot_dimension_numbers<[1], [0], [0], [1], [0, 0, 1, 1], [], []>} : vector<8x32xbf16>, vector<32x32xbf16>, vector<8x32xf32> -> vector<8x32xf32>
    %c0_9 = arith.constant 0 : index
    %c0_10 = arith.constant 0 : index
    %11 = vector.load %arg5[%c0_9, %c0_10] : memref<1x32xf32, #tpu.memory_space<vmem>>, vector<1x32xf32>
    %12 = vector.broadcast %11 : vector<1x32xf32> to vector<8x32xf32>
    %13 = arith.addf %10, %12 : vector<8x32xf32>
    %14 = tpu.iota {dimensions = array<i32: 1>} : vector<8x32xi32>
    %15 = arith.negf %13 : vector<8x32xf32>
    %16 = math.exp %15 : vector<8x32xf32>
    %cst_11 = arith.constant 1.000000e+00 : f32
    %17 = vector.broadcast %cst_11 : f32 to vector<8x32xf32>
    %18 = arith.addf %17, %16 : vector<8x32xf32>
    %19 = arith.divf %17, %18 : vector<8x32xf32>
    %cst_12 = arith.constant 0.899999976 : f32
    %20 = vector.broadcast %cst_12 : f32 to vector<8x32xf32>
    %21 = arith.mulf %20, %19 : vector<8x32xf32>
    %cst_13 = arith.constant 1.000000e-01 : f32
    %22 = vector.broadcast %cst_13 : f32 to vector<8x32xf32>
    %23 = arith.addf %22, %21 : vector<8x32xf32>
    %c16_i32 = arith.constant 16 : i32
    %24 = vector.broadcast %c16_i32 : i32 to vector<8x32xi32>
    %25 = arith.cmpi slt, %14, %24 : vector<8x32xi32>
    %26 = arith.select %25, %13, %23 : vector<8x32xi1>, vector<8x32xf32>
    %c0_14 = arith.constant 0 : index
    %c0_15 = arith.constant 0 : index
    %27 = vector.load %arg6[%c0_14, %c0_15] : memref<8x32xf32, #tpu.memory_space<vmem>>, vector<8x32xf32>
    tpu.vector_store %arg6[%c0_14, %c0_15], %26 {strides = array<i32>} : memref<8x32xf32, #tpu.memory_space<vmem>>, vector<8x32xf32>,
    return
  }
  func.func @transform_0(%arg0: i32) -> (i32, i32) {
    %c0_i32 = arith.constant 0 : i32
    %c0_i32_0 = arith.constant 0 : i32
    return %arg0, %c0_i32 : i32, i32
  }
  func.func @transform_1(%arg0: i32) -> (i32, i32) {
    %c0_i32 = arith.constant 0 : i32
    %c0_i32_0 = arith.constant 0 : i32
    %c0_i32_1 = arith.constant 0 : i32
    return %c0_i32, %c0_i32_0 : i32, i32
  }
  func.func @transform_2(%arg0: i32) -> (i32, i32) {
    %c0_i32 = arith.constant 0 : i32
    %c0_i32_0 = arith.constant 0 : i32
    %c0_i32_1 = arith.constant 0 : i32
    return %c0_i32, %c0_i32_0 : i32, i32
  }
  func.func @transform_3(%arg0: i32) -> (i32, i32) {
    %c0_i32 = arith.constant 0 : i32
    %c0_i32_0 = arith.constant 0 : i32
    %c0_i32_1 = arith.constant 0 : i32
    return %c0_i32, %c0_i32_0 : i32, i32
  }
  func.func @transform_4(%arg0: i32) -> (i32, i32) {
    %c0_i32 = arith.constant 0 : i32
    %c0_i32_0 = arith.constant 0 : i32
    %c0_i32_1 = arith.constant 0 : i32
    return %c0_i32, %c0_i32_0 : i32, i32
  }
  func.func @transform_5(%arg0: i32) -> (i32, i32) {
    %c0_i32 = arith.constant 0 : i32
    %c0_i32_0 = arith.constant 0 : i32
    return %arg0, %c0_i32 : i32, i32
  }
}

</mosaic_0001>

<bundles_post_ra>
// kernel: _forward_impl.1
= control target key start
LH: loop header
LB: loop body
LE: loop exit
PB: predicated region body
PF: predicated region fallthrough
CT: control target
= control target key end

     0   :  { %10 = vsyncpa [#allocation3], 0  ;;  %s255_s18 = smov [#allocation2]   ;;  %s314_s0 = inlined_call_operand.vmem [shape: bf16[8,32], index: 0, kind: input, shape index: {}]   ;;  %s315_s1 = inlined_call_operand.hbm [shape: bf16[32,32], index: 1, kind: input, shape index: {}]   ;;  %s316_s2 = inlined_call_operand.vmem [shape: f32[1,32], index: 2, kind: input, shape index: {}]   ;;  %s317_s3 = inlined_call_operand.vmem [shape: bf16[32,32], index: 3, kind: input, shape index: {}]   ;;  %s318_s4 = inlined_call_operand.vmem [shape: f32[1,32], index: 4, kind: input, shape index: {}]   ;;  %s319_s5 = inlined_call_operand.vmem [shape: f32[8,32], index: 5, kind: output, shape index: {}]  }
   0x1   :  { %s18_s19 = sshll.u32 %s255_s18, 4  ;;  %s19_s19 = int_to_ptr.vmem [resolvable:$true] %s18_s19 }
   0x2   :  { %s241_s20 = scalar_lea.vmem %s19_s19, 256  ;;  %p246_p1 = scmp.lt.s32.totalorder %s19_s19, %s19_s19 }
   0x3   :  { %p242_p0 = scmp.ne.s32.totalorder %s19_s19, %s241_s20  ;;  %p247_p2 = scmp.lt.s32.totalorder %s241_s20, %s241_s20 }
   0x5   :  { %p248_p3 = por %p247_p2, %p246_p1 }
   0x7   :  { %p249_p4 = pnand %p248_p3, %p242_p0 }
   0x9   :  { %252 = shalt.err (!%p249_p4)
}
   0xa   :  { %s256_s21 = smov 64   ;;  %s257_s22 = smov 4  }
   0xb   :  { %24 = dma.hbm_to_vmem [thread:$0]  %s315_s1, 256, %s19_s19, [#allocation3], %s256_s21, %s256_s21, %s257_s22  }
   0xc   :  { %253 = dma.done.wait [#allocation3], 256  }
   0xd   :  { %254 = vsyncadd [#allocation3], 4294967040  ;;  %v258_v0 = vmov 0.0   ;;  %vm259_vm0 = vmmov 0   ;;  %v225_v1 = vld [vmem:[#allocation2 + $0x8] sm:$0xff]   ;;  %v226_v2 = vld [vmem:[#allocation2] sm:$0xff]   ;;  %v171_v23 = vlaneseq }
   0xe   :  { %204 = vmatprep.subr.bf16.mxu0 %v258_v0  ;;  %208 = vmatprep.mubr.msk.bf16.mxu0 %vm259_vm0, %v258_v0  ;;  %v35_v3 = vld [vmem:[%s314_s0] sm:$0xf]  ;;  %vm59_vm1 = vcmask 261120   ;;  %v227_v4 = vld [vmem:[%s317_s3 + $0x8] sm:$0xff]  }
   0xf   :  { %212 = vmatprep.subr.bf16.mxu1 %v258_v0  ;;  %216 = vmatprep.mubr.msk.bf16.mxu1 %vm259_vm0, %v258_v0  ;;  %v228_v5 = vld [vmem:[%s317_s3] sm:$0xff]   ;;  %v172_v24 = vand.u32 127, %v171_v23 }
  0x10   :  { %205 = vmatpush3.bf16.msra.mxu0 %v225_v1  ;;  %213 = vmatpush3.bf16.msra.mxu1 %v227_v4  ;;  %v189_v6 = vld [vmem:[%s316_s2] ss:$0 sm:$0xff] }
  0x11   :  { %206 = vmatprep.subr.bf16.mxu0 %v258_v0  ;;  %214 = vmatprep.subr.bf16.mxu1 %v258_v0  ;;  %v193_v14 = vld [vmem:[%s318_s4] ss:$0 sm:$0xff]  ;;  %vm181_vm2 = vcmp.lt.s32.totalorder %v172_v24, 16 }
  0x14   :  { %207 = vmatpush3.bf16.msra.mxu0 %v226_v2  ;;  %215 = vmatpush3.bf16.msra.mxu1 %v228_v5 }
  0x17   :  { %209 = vmatmul.mubr.msk.bf16.vlgmr.msra.gmra.mxu0 %vm59_vm1, %v35_v3 }
  0xd7   :  { %v97_v7 = vpop.f32.mrf.mxu0 }
  0xd8   :  { %v98_v8 = vadd.f32 %v189_v6, %v97_v7 }
  0xd9   :  { %v210_v9 = vpop.f32.mrf.mxu0 }
  0xda   :  { %v103_v10 = vmax.f32 %v98_v8, 0.0 }
  0xdb   :  { %v100_v11 = vpop.f32.mrf.mxu0 }
  0xdc   :  { %v104_v12 = vpack.c.bf16 %v103_v10, %v103_v10 }
  0xdd   :  { %v211_v13 = vpop.f32.mrf.mxu0 }
  0xde   :  { %217 = vmatmul.mubr.msk.bf16.vlgmr.msra.gmra.mxu1 %vm59_vm1, %v104_v12 }
 0x19e   :  { %v165_v15 = vpop.f32.mrf.mxu1 }
 0x19f   :  { %v166_v16 = vadd.f32 %v193_v14, %v165_v15 }
 0x1a0   :  { %v218_v17 = vpop.f32.mrf.mxu1 }
 0x1a1   :  { %v197_v18 = vmul.f32 -1.442695, %v166_v16 }
 0x1a2   :  { %v168_v19 = vpop.f32.mrf.mxu1 }
 0x1a3   :  { %229 = vpow2.f32 %v197_v18 }
 0x1a4   :  { %v219_v20 = vpop.f32.mrf.mxu1 }
 0x1b0   :  { %v230_v21 = vpop.eup %229 }
 0x1b1   :  { %v176_v22 = vadd.f32 1.0, %v230_v21 }
 0x1b3   :  { %231 = vrcp.f32 %v176_v22 }
 0x1c0   :  { %v232_v25 = vpop.eup %231 }
 0x1c1   :  { %v179_v26 = vmul.f32 0.9, %v232_v25 }
 0x1c3   :  { %v180_v27 = vadd.f32 0.1, %v179_v26 }
 0x1c5   :  { %v182_v28 = vsel %vm181_vm2, %v166_v16, %v180_v27 }
 0x1c6   :  { %183 = vst.msk [vmem:[%s319_s5] sm:$0xff] %vm59_vm1, %v182_v28 }
 0x1c7   :  { %188 = vsyncpa [#allocation3], 1 }

</bundles_post_ra>
